<compile_context>
chip_gen: v7x
topology: tpu7x:2x2x1
jax: 0.10.0
libtpu: 0.0.40
codegen_flags: <defaults>
</compile_context>

<pallas_src>
import math
from functools import partial

import jax
import jax.numpy as jnp
from jax import lax
from jax.experimental import pallas as pl
from jax.experimental.pallas import tpu as pltpu


def _choose_q_tile(t_t, batch, t_s):
    """Largest 128-multiple tile dividing t_t (capped for long t_s); full axis otherwise.
    Prefers >= 2 q-tiles when batch == 1 so both v7x TensorCores get work."""
    cands = [c for c in (512, 256, 128) if t_t % c == 0]
    if t_s >= 2048:                       # bound the [tq, Ts] score tile
        capped = [c for c in cands if c <= 256]
        cands = capped or cands
    if not cands:
        return t_t
    if batch == 1:
        for c in cands:
            if t_t // c >= 2:
                return c
    return cands[0]


def _vmem_limit_bytes(C, Co, tq, ts, itemsize):
    """Rough per-step VMEM footprint -> explicit scoped-VMEM limit (v7x-safe cap)."""
    io_blocks = 2 * (C * tq + C * ts + Co * tq) * itemsize        # double-buffered I/O tiles
    weights = (3 * C * C + Co * C) * itemsize + (3 * C + Co) * 4  # resident weights + f32 biases
    scratch = (2 * C * tq + 2 * C * ts) * 4                       # q/attn scratch + K/V caches (f32)
    work = 3 * tq * ts * 4                                        # live score / softmax tiles
    est = io_blocks + weights + scratch + work + (8 << 20)
    return int(min(max(est, 32 << 20), 56 << 20))


def _mha_kernel(x_ref, c_ref,
                wq_ref, bq_ref, wk_ref, bk_ref, wv_ref, bv_ref, wo_ref, bo_ref,
                o_ref, q_scr, k_scr, v_scr, attn_scr,
                *, n_heads, k_channels, approx_recip):
    # x_ref  : [C, tq]   query-side input tile (channel-major, NCL native)
    # c_ref  : [C, Ts]   key/value-side input (resident per batch element)
    # wq_ref : [C, C]    query projection, 1/sqrt(kc) folded in
    # bq_ref : [C, 1]    f32 bias, scale folded in
    # wk/wv  : [C, C]    key / value projections (separate -> no fused-kv slicing)
    # bk/bv  : [C, 1]    f32 biases
    # wo_ref : [Co, C]   output projection
    # bo_ref : [Co, 1]   f32 output bias
    # o_ref  : [Co, tq]  output tile (lane-dense over time)
    # q_scr  : [C, tq]   f32, fused-head Q projection
    # k_scr  : [C, Ts]   f32, per-batch K cache (filled at t == 0)
    # v_scr  : [C, Ts]   f32, per-batch V cache (filled at t == 0)
    # attn_scr: [C, tq]  f32, per-head attention outputs (pre output-projection)
    t = pl.program_id(1)
    mm_dtype = x_ref.dtype   # bf16 (perf path) or f32 (exact path)

    # --- K/V projections: depend only on the batch index -> compute once per b. ---
    @pl.when(t == 0)
    def _project_kv():
        c = c_ref[...]                                                   # [C, Ts]
        k_scr[...] = jnp.dot(wk_ref[...], c,
                             preferred_element_type=jnp.float32) + bk_ref[...]
        v_scr[...] = jnp.dot(wv_ref[...], c,
                             preferred_element_type=jnp.float32) + bv_ref[...]

    # --- Q projection fused across all heads (scale pre-folded into Wq/bq). ---
    q_scr[...] = jnp.dot(wq_ref[...], x_ref[...],
                         preferred_element_type=jnp.float32) + bq_ref[...]

    # --- Per-head attention.  Static, sublane-aligned ref slices are zero-cost
    #     views; each head's result is stored straight into its [kc, tq] slab of
    #     attn_scr so live ranges stay bounded and no concat is needed. ---
    for h in range(n_heads):
        sl = slice(h * k_channels, (h + 1) * k_channels)
        q_h = q_scr[sl, :].astype(mm_dtype)          # [kc, tq]
        k_h = k_scr[sl, :].astype(mm_dtype)          # [kc, Ts]
        v_h = v_scr[sl, :].astype(mm_dtype)          # [kc, Ts]

        # scores[tq, Ts] = q_h^T @ k_h  (contract the kc sublane axis)
        s = lax.dot_general(q_h, k_h, (((0,), (0,)), ((), ())),
                            preferred_element_type=jnp.float32)
        s = s - jnp.max(s, axis=-1, keepdims=True)
        p = jnp.exp(s)
        denom = jnp.sum(p, axis=-1, keepdims=True)
        if approx_recip:                              # bf16 perf path: EUP reciprocal
            p = p * pl.reciprocal(denom, approx=True)
        else:                                         # f32 exact path: exact divide
            p = p / denom

        # o_h[kc, tq] = v_h @ p^T   (p cast to mm_dtype on the perf path)
        o_h = lax.dot_general(v_h, p.astype(mm_dtype), (((1,), (1,)), ((), ())),
                              preferred_element_type=jnp.float32)
        attn_scr[sl, :] = o_h

    # --- Single fused output projection + bias, channel-major (lane-dense store). ---
    out = jnp.dot(wo_ref[...], attn_scr[...].astype(mm_dtype),
                  preferred_element_type=jnp.float32) + bo_ref[...]
    o_ref[...] = out.astype(o_ref.dtype)


def multi_head_attention(x_ncl, c_ncl, params, *, n_heads,
                         matmul_dtype=jnp.bfloat16, tq=None):
    """x_ncl: [B, C, T_t], c_ncl: [B, C, T_s] (PyTorch Conv1d layout) -> [B, Co, T_t]."""
    B, C, Tt = x_ncl.shape
    Bc, Cc, Ts = c_ncl.shape
    assert Bc == B and Cc == C
    Co = params["wo"].shape[0]
    assert C % n_heads == 0
    kc = C // n_heads
    scale = 1.0 / math.sqrt(kc)

    if tq is None:
        tq = _choose_q_tile(Tt, B, Ts)
    if Tt % tq != 0:
        raise ValueError(f"query tile {tq} must divide t_t={Tt}")
    n_tq = Tt // tq

    # Inputs stay in NCL (channel-major); only a dtype cast for the MXU path.
    x = x_ncl.astype(matmul_dtype)                                   # [B, C, Tt]
    c = c_ncl.astype(matmul_dtype)                                   # [B, C, Ts]

    # Weights in PyTorch conv1x1 [out, in] layout are already what the
    # channel-major kernel wants (W @ x).  Scale folded into Wq/bq.
    wq = (params["wq"] * scale).astype(matmul_dtype)                 # [C, C]
    bq = (params["bq"] * scale).reshape(C, 1).astype(jnp.float32)
    wk = params["wk"].astype(matmul_dtype)                           # [C, C]
    bk = params["bk"].reshape(C, 1).astype(jnp.float32)
    wv = params["wv"].astype(matmul_dtype)                           # [C, C]
    bv = params["bv"].reshape(C, 1).astype(jnp.float32)
    wo = params["wo"].astype(matmul_dtype)                           # [Co, C]
    bo = params["bo"].reshape(Co, 1).astype(jnp.float32)

    kernel = partial(_mha_kernel, n_heads=n_heads, k_channels=kc,
                     approx_recip=(matmul_dtype != jnp.float32))

    vmem_limit = _vmem_limit_bytes(C, Co, tq, Ts, jnp.dtype(matmul_dtype).itemsize)

    out = pl.pallas_call(
        kernel,
        out_shape=jax.ShapeDtypeStruct((B, Co, Tt), x_ncl.dtype),
        grid_spec=pltpu.PrefetchScalarGridSpec(
            num_scalar_prefetch=0,
            grid=(B, n_tq),
            in_specs=[
                pl.BlockSpec((None, C, tq), lambda b, t: (b, 0, t)),   # x tile
                pl.BlockSpec((None, C, Ts), lambda b, t: (b, 0, 0)),   # c (per-b resident)
                pl.BlockSpec((C, C), lambda b, t: (0, 0)),             # Wq (scale folded)
                pl.BlockSpec((C, 1), lambda b, t: (0, 0)),             # bq
                pl.BlockSpec((C, C), lambda b, t: (0, 0)),             # Wk
                pl.BlockSpec((C, 1), lambda b, t: (0, 0)),             # bk
                pl.BlockSpec((C, C), lambda b, t: (0, 0)),             # Wv
                pl.BlockSpec((C, 1), lambda b, t: (0, 0)),             # bv
                pl.BlockSpec((Co, C), lambda b, t: (0, 0)),            # Wo
                pl.BlockSpec((Co, 1), lambda b, t: (0, 0)),            # bo
            ],
            out_specs=pl.BlockSpec((None, Co, tq), lambda b, t: (b, 0, t)),
            scratch_shapes=[
                pltpu.VMEM((C, tq), jnp.float32),   # q projection
                pltpu.VMEM((C, Ts), jnp.float32),   # K cache (per batch)
                pltpu.VMEM((C, Ts), jnp.float32),   # V cache (per batch)
                pltpu.VMEM((C, tq), jnp.float32),   # per-head attention outputs
            ],
        ),
        compiler_params=pltpu.CompilerParams(
            dimension_semantics=("parallel", "arbitrary"),
            vmem_limit_bytes=vmem_limit),
    )(x, c, wq, bq, wk, bk, wv, bv, wo, bo)

    return out    # already [B, Co, T_t] — no wrapper transpose


def _reference(x_ncl, c_ncl, params, *, n_heads):
    """Pure-JAX reference mirroring the PyTorch forward (window_size=None, no mask)."""
    B, C, Tt = x_ncl.shape
    Ts = c_ncl.shape[2]
    kc = C // n_heads

    def conv1x1(inp, w, b):   # inp [B,C,T], w [O,C], b [O]
        return jnp.einsum("oc,bct->bot", w, inp) + b[None, :, None]

    q = conv1x1(x_ncl, params["wq"], params["bq"])
    k = conv1x1(c_ncl, params["wk"], params["bk"])
    v = conv1x1(c_ncl, params["wv"], params["bv"])

    q = q.reshape(B, n_heads, kc, Tt).transpose(0, 1, 3, 2)   # [b,h,t_t,kc]
    k = k.reshape(B, n_heads, kc, Ts).transpose(0, 1, 3, 2)
    v = v.reshape(B, n_heads, kc, Ts).transpose(0, 1, 3, 2)
    scores = jnp.einsum("bhtd,bhsd->bhts", q, k) / math.sqrt(kc)
    p = jax.nn.softmax(scores, axis=-1)
    out = jnp.einsum("bhts,bhsd->bhtd", p, v)                  # [b,h,t_t,kc]
    out = out.transpose(0, 1, 3, 2).reshape(B, C, Tt)          # [b,C,t_t]
    return conv1x1(out, params["wo"], params["bo"])


def _xavier_uniform(key, out_c, in_c):
    bound = math.sqrt(6.0 / (in_c + out_c))
    return jax.random.uniform(key, (out_c, in_c), jnp.float32, -bound, bound)


if __name__ == "__main__":
    # Module defaults: window_size=None, p_dropout=0.0, proximal_bias=False,
    # block_length=None, attn_mask=None -> those branches are never taken.
    channels, out_channels, n_heads = 32, 32, 4
    B, Tt, Ts = 2, 16, 32

    key = jax.random.PRNGKey(0)
    ks = jax.random.split(key, 10)
    bb = 1.0 / math.sqrt(channels)   # PyTorch Conv1d default bias bound
    params = {
        "wq": _xavier_uniform(ks[0], channels, channels),
        "bq": jax.random.uniform(ks[1], (channels,), jnp.float32, -bb, bb),
        "wk": _xavier_uniform(ks[2], channels, channels),
        "bk": jax.random.uniform(ks[3], (channels,), jnp.float32, -bb, bb),
        "wv": _xavier_uniform(ks[4], channels, channels),
        "bv": jax.random.uniform(ks[5], (channels,), jnp.float32, -bb, bb),
        "wo": _xavier_uniform(ks[6], out_channels, channels),
        "bo": jax.random.uniform(ks[7], (out_channels,), jnp.float32, -bb, bb),
    }

    x = jax.random.normal(ks[8], (B, channels, Tt), jnp.float32)   # NCL like nn.Conv1d
    c = jax.random.normal(ks[9], (B, channels, Ts), jnp.float32)

    ref = _reference(x, c, params, n_heads=n_heads)

    # Exactness path: f32 matmul operands, exact softmax divide.
    out_f32 = multi_head_attention(x, c, params, n_heads=n_heads,
                                   matmul_dtype=jnp.float32)
    out_f32 = jax.block_until_ready(out_f32)
    assert out_f32.shape == (B, out_channels, Tt), out_f32.shape
    assert jnp.allclose(out_f32, ref, atol=2e-3, rtol=2e-3), \
        float(jnp.max(jnp.abs(out_f32 - ref)))

    # Performance path: bf16 MXU operands, f32 softmax/bias/caches, EUP reciprocal.
    out_bf16 = multi_head_attention(x, c, params, n_heads=n_heads,
                                    matmul_dtype=jnp.bfloat16)
    out_bf16 = jax.block_until_ready(out_bf16)
    assert out_bf16.shape == (B, out_channels, Tt), out_bf16.shape
    assert jnp.allclose(out_bf16, ref, atol=5e-2, rtol=5e-2), \
        float(jnp.max(jnp.abs(out_bf16 - ref)))

    print("KERNEL_OK")
</pallas_src>

<mosaic_0001>
module attributes {stable_mosaic.version = 11 : i64} {
  func.func @_mha_kernel(%arg0: i32, %arg1: i32, %arg2: memref<1x32x16xf32, #tpu.memory_space<vmem>>, %arg3: memref<1x32x32xf32, #tpu.memory_space<vmem>>, %arg4: memref<32x32xf32, #tpu.memory_space<vmem>>, %arg5: memref<32x1xf32, #tpu.memory_space<vmem>>, %arg6: memref<32x32xf32, #tpu.memory_space<vmem>>, %arg7: memref<32x1xf32, #tpu.memory_space<vmem>>, %arg8: memref<32x32xf32, #tpu.memory_space<vmem>>, %arg9: memref<32x1xf32, #tpu.memory_space<vmem>>, %arg10: memref<32x32xf32, #tpu.memory_space<vmem>>, %arg11: memref<32x1xf32, #tpu.memory_space<vmem>>, %arg12: memref<1x32x16xf32, #tpu.memory_space<vmem>>, %arg13: memref<32x16xf32, #tpu.memory_space<vmem>>, %arg14: memref<32x32xf32, #tpu.memory_space<vmem>>, %arg15: memref<32x32xf32, #tpu.memory_space<vmem>>, %arg16: memref<32x16xf32, #tpu.memory_space<vmem>>) attributes {dimension_semantics = [#tpu.dimension_semantics<parallel>, #tpu.dimension_semantics<arbitrary>], iteration_bounds = array<i64: 2, 1>, scalar_prefetch = 0 : i64, scratch_operands = 4 : i64, tpu.core_type = #tpu.core_type<tc>, window_params = [{transform_indices = @transform_0, window_bounds = array<i64: 1, 32, 16>}, {transform_indices = @transform_1, window_bounds = array<i64: 1, 32, 32>}, {pipeline_mode = #tpu.pipeline_mode<synchronous>, transform_indices = @transform_2, window_bounds = array<i64: 32, 32>}, {pipeline_mode = #tpu.pipeline_mode<synchronous>, transform_indices = @transform_3, window_bounds = array<i64: 32, 1>}, {pipeline_mode = #tpu.pipeline_mode<synchronous>, transform_indices = @transform_4, window_bounds = array<i64: 32, 32>}, {pipeline_mode = #tpu.pipeline_mode<synchronous>, transform_indices = @transform_5, window_bounds = array<i64: 32, 1>}, {pipeline_mode = #tpu.pipeline_mode<synchronous>, transform_indices = @transform_6, window_bounds = array<i64: 32, 32>}, {pipeline_mode = #tpu.pipeline_mode<synchronous>, transform_indices = @transform_7, window_bounds = array<i64: 32, 1>}, {pipeline_mode = #tpu.pipeline_mode<synchronous>, transform_indices = @transform_8, window_bounds = array<i64: 32, 32>}, {pipeline_mode = #tpu.pipeline_mode<synchronous>, transform_indices = @transform_9, window_bounds = array<i64: 32, 1>}, {transform_indices = @transform_10, window_bounds = array<i64: 1, 32, 16>}]} {
    %c0_i32 = arith.constant 0 : i32
    %0 = arith.cmpi eq, %arg1, %c0_i32 : i32
    %1 = arith.extui %0 : i1 to i32
    %c0_i32_0 = arith.constant 0 : i32
    %2 = arith.cmpi ne, %1, %c0_i32_0 : i32
    scf.if %2 {
      %c0_64 = arith.constant 0 : index
      %c0_65 = arith.constant 0 : index
      %c0_66 = arith.constant 0 : index
      %80 = vector.load %arg3[%c0_64, %c0_65, %c0_66] : memref<1x32x32xf32, #tpu.memory_space<vmem>>, vector<1x32x32xf32>
      %81 = vector.shape_cast %80 : vector<1x32x32xf32> to vector<32x32xf32>
      %c0_67 = arith.constant 0 : index
      %c0_68 = arith.constant 0 : index
      %82 = vector.load %arg6[%c0_67, %c0_68] : memref<32x32xf32, #tpu.memory_space<vmem>>, vector<32x32xf32>
      %cst_69 = arith.constant dense<0.000000e+00> : vector<32x32xf32>
      %83 = tpu.matmul %82, %81, %cst_69 {dimension_numbers = #tpu.dot_dimension_numbers<[1], [0], [0], [1], [0, 0, 1, 1], [], []>} : vector<32x32xf32>, vector<32x32xf32>, vector<32x32xf32> -> vector<32x32xf32>
      %c0_70 = arith.constant 0 : index
      %c0_71 = arith.constant 0 : index
      %84 = vector.load %arg7[%c0_70, %c0_71] : memref<32x1xf32, #tpu.memory_space<vmem>>, vector<32x1xf32>
      %85 = vector.broadcast %84 : vector<32x1xf32> to vector<32x32xf32>
      %86 = arith.addf %83, %85 : vector<32x32xf32>
      %c0_72 = arith.constant 0 : index
      %c0_73 = arith.constant 0 : index
      %87 = vector.load %arg14[%c0_72, %c0_73] : memref<32x32xf32, #tpu.memory_space<vmem>>, vector<32x32xf32>
      tpu.vector_store %arg14[%c0_72, %c0_73], %86 {strides = array<i32>} : memref<32x32xf32, #tpu.memory_space<vmem>>, vector<32x32xf32>,
      %c0_74 = arith.constant 0 : index
      %c0_75 = arith.constant 0 : index
      %88 = vector.load %arg8[%c0_74, %c0_75] : memref<32x32xf32, #tpu.memory_space<vmem>>, vector<32x32xf32>
      %cst_76 = arith.constant dense<0.000000e+00> : vector<32x32xf32>
      %89 = tpu.matmul %88, %81, %cst_76 {dimension_numbers = #tpu.dot_dimension_numbers<[1], [0], [0], [1], [0, 0, 1, 1], [], []>} : vector<32x32xf32>, vector<32x32xf32>, vector<32x32xf32> -> vector<32x32xf32>
      %c0_77 = arith.constant 0 : index
      %c0_78 = arith.constant 0 : index
      %90 = vector.load %arg9[%c0_77, %c0_78] : memref<32x1xf32, #tpu.memory_space<vmem>>, vector<32x1xf32>
      %91 = vector.broadcast %90 : vector<32x1xf32> to vector<32x32xf32>
      %92 = arith.addf %89, %91 : vector<32x32xf32>
      %c0_79 = arith.constant 0 : index
      %c0_80 = arith.constant 0 : index
      %93 = vector.load %arg15[%c0_79, %c0_80] : memref<32x32xf32, #tpu.memory_space<vmem>>, vector<32x32xf32>
      tpu.vector_store %arg15[%c0_79, %c0_80], %92 {strides = array<i32>} : memref<32x32xf32, #tpu.memory_space<vmem>>, vector<32x32xf32>,
    } else {
    }
    %c0 = arith.constant 0 : index
    %c0_1 = arith.constant 0 : index
    %3 = vector.load %arg4[%c0, %c0_1] : memref<32x32xf32, #tpu.memory_space<vmem>>, vector<32x32xf32>
    %c0_2 = arith.constant 0 : index
    %c0_3 = arith.constant 0 : index
    %c0_4 = arith.constant 0 : index
    %4 = vector.load %arg2[%c0_2, %c0_3, %c0_4] : memref<1x32x16xf32, #tpu.memory_space<vmem>>, vector<1x32x16xf32>
    %5 = vector.shape_cast %4 : vector<1x32x16xf32> to vector<32x16xf32>
    %cst = arith.constant dense<0.000000e+00> : vector<32x16xf32>
    %6 = tpu.matmul %3, %5, %cst {dimension_numbers = #tpu.dot_dimension_numbers<[1], [0], [0], [1], [0, 0, 1, 1], [], []>} : vector<32x32xf32>, vector<32x16xf32>, vector<32x16xf32> -> vector<32x16xf32>
    %c0_5 = arith.constant 0 : index
    %c0_6 = arith.constant 0 : index
    %7 = vector.load %arg5[%c0_5, %c0_6] : memref<32x1xf32, #tpu.memory_space<vmem>>, vector<32x1xf32>
    %8 = vector.broadcast %7 : vector<32x1xf32> to vector<32x16xf32>
    %9 = arith.addf %6, %8 : vector<32x16xf32>
    %c0_7 = arith.constant 0 : index
    %c0_8 = arith.constant 0 : index
    %10 = vector.load %arg13[%c0_7, %c0_8] : memref<32x16xf32, #tpu.memory_space<vmem>>, vector<32x16xf32>
    tpu.vector_store %arg13[%c0_7, %c0_8], %9 {strides = array<i32>} : memref<32x16xf32, #tpu.memory_space<vmem>>, vector<32x16xf32>,
    %c0_9 = arith.constant 0 : index
    %c0_10 = arith.constant 0 : index
    %11 = vector.load %arg13[%c0_9, %c0_10] : memref<32x16xf32, #tpu.memory_space<vmem>>, vector<8x16xf32>
    %c0_11 = arith.constant 0 : index
    %c0_12 = arith.constant 0 : index
    %12 = vector.load %arg14[%c0_11, %c0_12] : memref<32x32xf32, #tpu.memory_space<vmem>>, vector<8x32xf32>
    %c0_13 = arith.constant 0 : index
    %c0_14 = arith.constant 0 : index
    %13 = vector.load %arg15[%c0_13, %c0_14] : memref<32x32xf32, #tpu.memory_space<vmem>>, vector<8x32xf32>
    %cst_15 = arith.constant dense<0.000000e+00> : vector<16x32xf32>
    %14 = tpu.matmul %11, %12, %cst_15 {dimension_numbers = #tpu.dot_dimension_numbers<[0], [0], [1], [1], [0, 1, 1, 1], [], []>} : vector<8x16xf32>, vector<8x32xf32>, vector<16x32xf32> -> vector<16x32xf32>
    %cst_16 = arith.constant dense<0xFF800000> : vector<16xf32>
    %15 = vector.multi_reduction <maximumf>, %14, %cst_16 [1] : vector<16x32xf32> to vector<16xf32>
    %16 = vector.shape_cast %15 : vector<16xf32> to vector<16x1xf32>
    %17 = vector.broadcast %16 : vector<16x1xf32> to vector<16x32xf32>
    %18 = arith.subf %14, %17 : vector<16x32xf32>
    %19 = math.exp %18 : vector<16x32xf32>
    %cst_17 = arith.constant dense<0.000000e+00> : vector<16xf32>
    %20 = vector.multi_reduction <add>, %19, %cst_17 [1] : vector<16x32xf32> to vector<16xf32>
    %21 = vector.shape_cast %20 : vector<16xf32> to vector<16x1xf32>
    %22 = vector.broadcast %21 : vector<16x1xf32> to vector<16x32xf32>
    %23 = arith.divf %19, %22 : vector<16x32xf32>
    %cst_18 = arith.constant dense<0.000000e+00> : vector<8x16xf32>
    %24 = tpu.matmul %13, %23, %cst_18 {dimension_numbers = #tpu.dot_dimension_numbers<[1], [1], [0], [0], [0, 0, 1, 0], [], []>} : vector<8x32xf32>, vector<16x32xf32>, vector<8x16xf32> -> vector<8x16xf32>
    %c0_19 = arith.constant 0 : index
    %c0_20 = arith.constant 0 : index
    %25 = vector.load %arg16[%c0_19, %c0_20] : memref<32x16xf32, #tpu.memory_space<vmem>>, vector<8x16xf32>
    tpu.vector_store %arg16[%c0_19, %c0_20], %24 {strides = array<i32>} : memref<32x16xf32, #tpu.memory_space<vmem>>, vector<8x16xf32>,
    %c8 = arith.constant 8 : index
    %c0_21 = arith.constant 0 : index
    %26 = vector.load %arg13[%c8, %c0_21] : memref<32x16xf32, #tpu.memory_space<vmem>>, vector<8x16xf32>
    %c8_22 = arith.constant 8 : index
    %c0_23 = arith.constant 0 : index
    %27 = vector.load %arg14[%c8_22, %c0_23] : memref<32x32xf32, #tpu.memory_space<vmem>>, vector<8x32xf32>
    %c8_24 = arith.constant 8 : index
    %c0_25 = arith.constant 0 : index
    %28 = vector.load %arg15[%c8_24, %c0_25] : memref<32x32xf32, #tpu.memory_space<vmem>>, vector<8x32xf32>
    %cst_26 = arith.constant dense<0.000000e+00> : vector<16x32xf32>
    %29 = tpu.matmul %26, %27, %cst_26 {dimension_numbers = #tpu.dot_dimension_numbers<[0], [0], [1], [1], [0, 1, 1, 1], [], []>} : vector<8x16xf32>, vector<8x32xf32>, vector<16x32xf32> -> vector<16x32xf32>
    %cst_27 = arith.constant dense<0xFF800000> : vector<16xf32>
    %30 = vector.multi_reduction <maximumf>, %29, %cst_27 [1] : vector<16x32xf32> to vector<16xf32>
    %31 = vector.shape_cast %30 : vector<16xf32> to vector<16x1xf32>
    %32 = vector.broadcast %31 : vector<16x1xf32> to vector<16x32xf32>
    %33 = arith.subf %29, %32 : vector<16x32xf32>
    %34 = math.exp %33 : vector<16x32xf32>
    %cst_28 = arith.constant dense<0.000000e+00> : vector<16xf32>
    %35 = vector.multi_reduction <add>, %34, %cst_28 [1] : vector<16x32xf32> to vector<16xf32>
    %36 = vector.shape_cast %35 : vector<16xf32> to vector<16x1xf32>
    %37 = vector.broadcast %36 : vector<16x1xf32> to vector<16x32xf32>
    %38 = arith.divf %34, %37 : vector<16x32xf32>
    %cst_29 = arith.constant dense<0.000000e+00> : vector<8x16xf32>
    %39 = tpu.matmul %28, %38, %cst_29 {dimension_numbers = #tpu.dot_dimension_numbers<[1], [1], [0], [0], [0, 0, 1, 0], [], []>} : vector<8x32xf32>, vector<16x32xf32>, vector<8x16xf32> -> vector<8x16xf32>
    %c8_30 = arith.constant 8 : index
    %c0_31 = arith.constant 0 : index
    %40 = vector.load %arg16[%c8_30, %c0_31] : memref<32x16xf32, #tpu.memory_space<vmem>>, vector<8x16xf32>
    tpu.vector_store %arg16[%c8_30, %c0_31], %39 {strides = array<i32>} : memref<32x16xf32, #tpu.memory_space<vmem>>, vector<8x16xf32>,
    %c16 = arith.constant 16 : index
    %c0_32 = arith.constant 0 : index
    %41 = vector.load %arg13[%c16, %c0_32] : memref<32x16xf32, #tpu.memory_space<vmem>>, vector<8x16xf32>
    %c16_33 = arith.constant 16 : index
    %c0_34 = arith.constant 0 : index
    %42 = vector.load %arg14[%c16_33, %c0_34] : memref<32x32xf32, #tpu.memory_space<vmem>>, vector<8x32xf32>
    %c16_35 = arith.constant 16 : index
    %c0_36 = arith.constant 0 : index
    %43 = vector.load %arg15[%c16_35, %c0_36] : memref<32x32xf32, #tpu.memory_space<vmem>>, vector<8x32xf32>
    %cst_37 = arith.constant dense<0.000000e+00> : vector<16x32xf32>
    %44 = tpu.matmul %41, %42, %cst_37 {dimension_numbers = #tpu.dot_dimension_numbers<[0], [0], [1], [1], [0, 1, 1, 1], [], []>} : vector<8x16xf32>, vector<8x32xf32>, vector<16x32xf32> -> vector<16x32xf32>
    %cst_38 = arith.constant dense<0xFF800000> : vector<16xf32>
    %45 = vector.multi_reduction <maximumf>, %44, %cst_38 [1] : vector<16x32xf32> to vector<16xf32>
    %46 = vector.shape_cast %45 : vector<16xf32> to vector<16x1xf32>
    %47 = vector.broadcast %46 : vector<16x1xf32> to vector<16x32xf32>
    %48 = arith.subf %44, %47 : vector<16x32xf32>
    %49 = math.exp %48 : vector<16x32xf32>
    %cst_39 = arith.constant dense<0.000000e+00> : vector<16xf32>
    %50 = vector.multi_reduction <add>, %49, %cst_39 [1] : vector<16x32xf32> to vector<16xf32>
    %51 = vector.shape_cast %50 : vector<16xf32> to vector<16x1xf32>
    %52 = vector.broadcast %51 : vector<16x1xf32> to vector<16x32xf32>
    %53 = arith.divf %49, %52 : vector<16x32xf32>
    %cst_40 = arith.constant dense<0.000000e+00> : vector<8x16xf32>
    %54 = tpu.matmul %43, %53, %cst_40 {dimension_numbers = #tpu.dot_dimension_numbers<[1], [1], [0], [0], [0, 0, 1, 0], [], []>} : vector<8x32xf32>, vector<16x32xf32>, vector<8x16xf32> -> vector<8x16xf32>
    %c16_41 = arith.constant 16 : index
    %c0_42 = arith.constant 0 : index
    %55 = vector.load %arg16[%c16_41, %c0_42] : memref<32x16xf32, #tpu.memory_space<vmem>>, vector<8x16xf32>
    tpu.vector_store %arg16[%c16_41, %c0_42], %54 {strides = array<i32>} : memref<32x16xf32, #tpu.memory_space<vmem>>, vector<8x16xf32>,
    %c24 = arith.constant 24 : index
    %c0_43 = arith.constant 0 : index
    %56 = vector.load %arg13[%c24, %c0_43] : memref<32x16xf32, #tpu.memory_space<vmem>>, vector<8x16xf32>
    %c24_44 = arith.constant 24 : index
    %c0_45 = arith.constant 0 : index
    %57 = vector.load %arg14[%c24_44, %c0_45] : memref<32x32xf32, #tpu.memory_space<vmem>>, vector<8x32xf32>
    %c24_46 = arith.constant 24 : index
    %c0_47 = arith.constant 0 : index
    %58 = vector.load %arg15[%c24_46, %c0_47] : memref<32x32xf32, #tpu.memory_space<vmem>>, vector<8x32xf32>
    %cst_48 = arith.constant dense<0.000000e+00> : vector<16x32xf32>
    %59 = tpu.matmul %56, %57, %cst_48 {dimension_numbers = #tpu.dot_dimension_numbers<[0], [0], [1], [1], [0, 1, 1, 1], [], []>} : vector<8x16xf32>, vector<8x32xf32>, vector<16x32xf32> -> vector<16x32xf32>
    %cst_49 = arith.constant dense<0xFF800000> : vector<16xf32>
    %60 = vector.multi_reduction <maximumf>, %59, %cst_49 [1] : vector<16x32xf32> to vector<16xf32>
    %61 = vector.shape_cast %60 : vector<16xf32> to vector<16x1xf32>
    %62 = vector.broadcast %61 : vector<16x1xf32> to vector<16x32xf32>
    %63 = arith.subf %59, %62 : vector<16x32xf32>
    %64 = math.exp %63 : vector<16x32xf32>
    %cst_50 = arith.constant dense<0.000000e+00> : vector<16xf32>
    %65 = vector.multi_reduction <add>, %64, %cst_50 [1] : vector<16x32xf32> to vector<16xf32>
    %66 = vector.shape_cast %65 : vector<16xf32> to vector<16x1xf32>
    %67 = vector.broadcast %66 : vector<16x1xf32> to vector<16x32xf32>
    %68 = arith.divf %64, %67 : vector<16x32xf32>
    %cst_51 = arith.constant dense<0.000000e+00> : vector<8x16xf32>
    %69 = tpu.matmul %58, %68, %cst_51 {dimension_numbers = #tpu.dot_dimension_numbers<[1], [1], [0], [0], [0, 0, 1, 0], [], []>} : vector<8x32xf32>, vector<16x32xf32>, vector<8x16xf32> -> vector<8x16xf32>
    %c24_52 = arith.constant 24 : index
    %c0_53 = arith.constant 0 : index
    %70 = vector.load %arg16[%c24_52, %c0_53] : memref<32x16xf32, #tpu.memory_space<vmem>>, vector<8x16xf32>
    tpu.vector_store %arg16[%c24_52, %c0_53], %69 {strides = array<i32>} : memref<32x16xf32, #tpu.memory_space<vmem>>, vector<8x16xf32>,
    %c0_54 = arith.constant 0 : index
    %c0_55 = arith.constant 0 : index
    %71 = vector.load %arg10[%c0_54, %c0_55] : memref<32x32xf32, #tpu.memory_space<vmem>>, vector<32x32xf32>
    %c0_56 = arith.constant 0 : index
    %c0_57 = arith.constant 0 : index
    %72 = vector.load %arg16[%c0_56, %c0_57] : memref<32x16xf32, #tpu.memory_space<vmem>>, vector<32x16xf32>
    %cst_58 = arith.constant dense<0.000000e+00> : vector<32x16xf32>
    %73 = tpu.matmul %71, %72, %cst_58 {dimension_numbers = #tpu.dot_dimension_numbers<[1], [0], [0], [1], [0, 0, 1, 1], [], []>} : vector<32x32xf32>, vector<32x16xf32>, vector<32x16xf32> -> vector<32x16xf32>
    %c0_59 = arith.constant 0 : index
    %c0_60 = arith.constant 0 : index
    %74 = vector.load %arg11[%c0_59, %c0_60] : memref<32x1xf32, #tpu.memory_space<vmem>>, vector<32x1xf32>
    %75 = vector.broadcast %74 : vector<32x1xf32> to vector<32x16xf32>
    %76 = arith.addf %73, %75 : vector<32x16xf32>
    %c0_61 = arith.constant 0 : index
    %c0_62 = arith.constant 0 : index
    %c0_63 = arith.constant 0 : index
    %77 = vector.load %arg12[%c0_61, %c0_62, %c0_63] : memref<1x32x16xf32, #tpu.memory_space<vmem>>, vector<1x32x16xf32>
    %78 = vector.shape_cast %77 : vector<1x32x16xf32> to vector<32x16xf32>
    %79 = vector.shape_cast %76 : vector<32x16xf32> to vector<1x32x16xf32>
    tpu.vector_store %arg12[%c0_61, %c0_62, %c0_63], %79 {strides = array<i32>} : memref<1x32x16xf32, #tpu.memory_space<vmem>>, vector<1x32x16xf32>,
    return
  }
  func.func @transform_0(%arg0: i32, %arg1: i32) -> (i32, i32, i32) {
    %c0_i32 = arith.constant 0 : i32
    %c0_i32_0 = arith.constant 0 : i32
    return %arg0, %c0_i32, %arg1 : i32, i32, i32
  }
  func.func @transform_1(%arg0: i32, %arg1: i32) -> (i32, i32, i32) {
    %c0_i32 = arith.constant 0 : i32
    %c0_i32_0 = arith.constant 0 : i32
    %c0_i32_1 = arith.constant 0 : i32
    return %arg0, %c0_i32, %c0_i32_0 : i32, i32, i32
  }
  func.func @transform_2(%arg0: i32, %arg1: i32) -> (i32, i32) {
    %c0_i32 = arith.constant 0 : i32
    %c0_i32_0 = arith.constant 0 : i32
    %c0_i32_1 = arith.constant 0 : i32
    return %c0_i32, %c0_i32_0 : i32, i32
  }
  func.func @transform_3(%arg0: i32, %arg1: i32) -> (i32, i32) {
    %c0_i32 = arith.constant 0 : i32
    %c0_i32_0 = arith.constant 0 : i32
    %c0_i32_1 = arith.constant 0 : i32
    return %c0_i32, %c0_i32_0 : i32, i32
  }
  func.func @transform_4(%arg0: i32, %arg1: i32) -> (i32, i32) {
    %c0_i32 = arith.constant 0 : i32
    %c0_i32_0 = arith.constant 0 : i32
    %c0_i32_1 = arith.constant 0 : i32
    return %c0_i32, %c0_i32_0 : i32, i32
  }
  func.func @transform_5(%arg0: i32, %arg1: i32) -> (i32, i32) {
    %c0_i32 = arith.constant 0 : i32
    %c0_i32_0 = arith.constant 0 : i32
    %c0_i32_1 = arith.constant 0 : i32
    return %c0_i32, %c0_i32_0 : i32, i32
  }
  func.func @transform_6(%arg0: i32, %arg1: i32) -> (i32, i32) {
    %c0_i32 = arith.constant 0 : i32
    %c0_i32_0 = arith.constant 0 : i32
    %c0_i32_1 = arith.constant 0 : i32
    return %c0_i32, %c0_i32_0 : i32, i32
  }
  func.func @transform_7(%arg0: i32, %arg1: i32) -> (i32, i32) {
    %c0_i32 = arith.constant 0 : i32
    %c0_i32_0 = arith.constant 0 : i32
    %c0_i32_1 = arith.constant 0 : i32
    return %c0_i32, %c0_i32_0 : i32, i32
  }
  func.func @transform_8(%arg0: i32, %arg1: i32) -> (i32, i32) {
    %c0_i32 = arith.constant 0 : i32
    %c0_i32_0 = arith.constant 0 : i32
    %c0_i32_1 = arith.constant 0 : i32
    return %c0_i32, %c0_i32_0 : i32, i32
  }
  func.func @transform_9(%arg0: i32, %arg1: i32) -> (i32, i32) {
    %c0_i32 = arith.constant 0 : i32
    %c0_i32_0 = arith.constant 0 : i32
    %c0_i32_1 = arith.constant 0 : i32
    return %c0_i32, %c0_i32_0 : i32, i32
  }
  func.func @transform_10(%arg0: i32, %arg1: i32) -> (i32, i32, i32) {
    %c0_i32 = arith.constant 0 : i32
    %c0_i32_0 = arith.constant 0 : i32
    return %arg0, %c0_i32, %arg1 : i32, i32, i32
  }
}

</mosaic_0001>

<bundles_post_ra>
// kernel: tpu_custom_call.1
= control target key start
LH: loop header
LB: loop body
LE: loop exit
PB: predicated region body
PF: predicated region fallthrough
CT: control target
= control target key end

     0   :  { %s2319_s13 = smov 0   ;;  %s2321_s14 = smov 0   ;;  %s2569_s0 = inlined_call_operand.vmem [shape: f32[2,32,16], index: 0, kind: input, shape index: {}]   ;;  %s2570_s1 = inlined_call_operand.vmem [shape: f32[2,32,32], index: 1, kind: input, shape index: {}]   ;;  %s2571_s2 = inlined_call_operand.vmem [shape: f32[32,32], index: 2, kind: input, shape index: {}]   ;;  %s2572_s3 = inlined_call_operand.vmem [shape: f32[32,1], index: 3, kind: input, shape index: {}]   ;;  %s2573_s4 = inlined_call_operand.vmem [shape: f32[32,32], index: 4, kind: input, shape index: {}]   ;;  %s2574_s5 = inlined_call_operand.vmem [shape: f32[32,1], index: 5, kind: input, shape index: {}]   ;;  %s2575_s6 = inlined_call_operand.vmem [shape: f32[32,32], index: 6, kind: input, shape index: {}]   ;;  %s2576_s7 = inlined_call_operand.vmem [shape: f32[32,1], index: 7, kind: input, shape index: {}]   ;;  %s2577_s8 = inlined_call_operand.vmem [shape: f32[32,32], index: 8, kind: input, shape index: {}]   ;;  %s2578_s9 = inlined_call_operand.vmem [shape: f32[32,1], index: 9, kind: input, shape index: {}]   ;;  %s2579_s10 = inlined_call_operand.vmem [shape: f32[2,32,16], index: 10, kind: output, shape index: {}]  }
   0x1   :  { %s2323_s15 = smov 0  }
   0x2 LB: > { %s32_s16 = sadd.s32 1, %s2254_s14  ;;  %p1918_p0 = scmp.ge.s32.totalorder %s2258_s15, 1  ;;  %s2258_s15 = sphi %s2323_s15, %s20_s15   ;;  %s2254_s14 = sphi %s2321_s14, %s2583_s14   ;;  %s2250_s13 = sphi %s2319_s13, %s2582_s13  }
   0x3   : > { %p34_p1 = scmp.ge.s32.totalorder %s32_s16, 2  ;;  %p341_p2 = scmp.lt.s32.totalorder %s2258_s15, 3 }
   0x5   : > { %s2585_s16 = smov (%p34_p1, %s32_s16), 0  ;;  %p342_p3 = pnand %p1918_p0, %p341_p2 }
   0x6   : > { %p390_p4 = scmp.lt.s32.totalorder (!%p342_p3), %s2250_s13, 1  ;;  %v419_v0 = vld [vmem:[%s2573_s4] sm:$0xff] (!%p342_p3)  ;;  %vm447_vm0 = vcmask (!%p342_p3), 261120   ;;  %v2260_v1 = vmov (!%p342_p3), 0   ;;  %v424_v4 = vld [vmem:[%s2574_s5 + $0x8] sm:$0xff] (!%p342_p3)  ;;  %v421_v18 = vld [vmem:[%s2573_s4 + $0x10] sm:$0xff] (!%p342_p3) }
   0x7   : > { %345 = sbr.rel (%p342_p3) target bundleno = 1948 (0x79c), region = 60  ;;  %2030 = vmatprep.mubr.msk.f32.mxu0 (!%p342_p3), %vm447_vm0, %v419_v0  ;;  %2203 = vset.pattern.permute.xlu1 (!%p342_p3), %v2260_v1  ;;  %v423_v2 = vld [vmem:[%s2574_s5] sm:$0xff] (!%p342_p3)  ;;  %v687_v5 = vld [vmem:[%s2572_s3 + $0x8] sm:$0xff] (!%p342_p3)  ;;  %v422_v20 = vld [vmem:[%s2573_s4 + $0x18] sm:$0xff] (!%p342_p3)  ;;  %vm808_vm1 = vcmask (!%p342_p3), 130048   ;;  %vm848_vm2 = vcmask (!%p342_p3), 64512  }
   0x8   : > { %2202 = vset.pattern.permute.xlu0 (!%p342_p3), %v2260_v1  ;;  %v686_v3 = vld [vmem:[%s2572_s3] sm:$0xff] (!%p342_p3)  ;;  %429 = vperm.xlu1 (!%p342_p3), %2203, %v423_v2   ;;  %v420_v17 = vld [vmem:[%s2573_s4 + $0x8] sm:$0xff] (!%p342_p3)  ;;  %v551_v25 = vld [vmem:[%s2575_s6 + $0x10] sm:$0xff] (!%p342_p3)  ;;  %vm2262_vm3 = vmmov (!%p342_p3), 0  }
   0x9   : > { %692 = vperm.xlu0 (!%p342_p3), %2202, %v686_v3   ;;  %v678_v21 = vld [vmem:[%s2571_s2] sm:$0xff] (!%p342_p3)  ;;  %v679_v22 = vld [vmem:[%s2571_s2 + $0x8] sm:$0xff] (!%p342_p3)  ;;  %v552_v44 = vld [vmem:[%s2575_s6 + $0x18] sm:$0xff] (!%p342_p3) }
   0xa   : > { %v549_v23 = vld [vmem:[%s2575_s6] sm:$0xff] (!%p342_p3)  ;;  %v550_v24 = vld [vmem:[%s2575_s6 + $0x8] sm:$0xff] (!%p342_p3)  ;;  %v680_v45 = vld [vmem:[%s2571_s2 + $0x10] sm:$0xff] (!%p342_p3) }
   0xb   : > { %2044 = vmatprep.mubr.msk.f32.mxu1 (!%p342_p3), %vm447_vm0, %v549_v23  ;;  %v681_v46 = vld [vmem:[%s2571_s2 + $0x18] sm:$0xff] (!%p342_p3)  ;;  %v688_v63 = vld [vmem:[%s2572_s3 + $0x10] sm:$0xff] (!%p342_p3)  ;;  %v554_v1 = vld [vmem:[%s2576_s7 + $0x8] sm:$0xff] (!%p342_p3) }
   0xc   : > { %434 = vperm.xlu1 (!%p342_p3), %2203, %v424_v4   ;;  %v689_v61 = vld [vmem:[%s2572_s3 + $0x18] sm:$0xff] (!%p342_p3)  ;;  %vm2467_vm4 = vmpackc.low (!%p342_p3), %vm447_vm0, %vm447_vm0 }
   0xd   : > { %697 = vperm.xlu0 (!%p342_p3), %2202, %v687_v5  }
   0xe   : > { %s2587_s13 = smov (!%p390_p4, %s2250_s13), 1 }
   0xf   : > { %s2347_s23 = sshll.u32 %s2587_s13, 5 }
  0x10   : > { %s402_s30 = scalar_lea.vmem %s2570_s1, %s2347_s23  ;;  %s397_s17 = scalar_lea.vmem %s2569_s0, %s2347_s23 }
  0x11   : > { %v415_v6 = vld [vmem:[%s402_s30] sm:$0xff]  ;;  %v416_v7 = vld [vmem:[%s402_s30 + $0x8] sm:$0xff]  ;;  %v417_v8 = vld [vmem:[%s402_s30 + $0x10] sm:$0xff]  ;;  %s410_s26 = scalar_lea.vmem %s2579_s10, %s2347_s23 }
  0x12   : > { %v2126_v9 = vpack.c.bf16 %v416_v7, %v415_v6  ;;  %v418_v10 = vld [vmem:[%s402_s30 + $0x18] sm:$0xff]  ;;  %v682_v12 = vld [vmem:[%s397_s17] sm:$0xff]  ;;  %v683_v13 = vld [vmem:[%s397_s17 + $0x8] sm:$0xff] }
  0x13   : > { %v2130_v11 = vpack.c.bf16 %v418_v10, %v417_v8  ;;  %v2142_v14 = vpack.c.bf16 %v683_v13, %v682_v12  ;;  %v684_v15 = vld [vmem:[%s397_s17 + $0x10] sm:$0xff]  ;;  %v685_v16 = vld [vmem:[%s397_s17 + $0x18] sm:$0xff] }
  0x14   : > { %2127 = vmatprep.subr.bf16.mxu0 %v2126_v9  ;;  %2135 = vmatprep.subr.bf16.mxu1 %v2126_v9  ;;  %v2146_v19 = vpack.c.bf16 %v685_v16, %v684_v15 }
  0x15   : > { %2129 = vmatpush3.bf16.msra.mxu0 %v2126_v9  ;;  %2137 = vmatpush3.bf16.msra.mxu1 %v2126_v9 }
  0x16   : > { %2131 = vmatprep.subr.bf16.mxu0 %v2130_v11  ;;  %2139 = vmatprep.subr.bf16.mxu1 %v2130_v11 }
  0x19   : > { %2133 = vmatpush3.bf16.msra.mxu0 %v2130_v11  ;;  %2141 = vmatpush3.bf16.msra.mxu1 %v2130_v11 }
  0x1a   : > { %2143 = vmatprep.subr.bf16.mxu0 %v2142_v14 }
  0x1c   : > { %2031 = vmatmul.mubr.msk.f32.vlgmr.msra.gmra.mrb[0].mxu0 %vm447_vm0, %v420_v17  ;;  %2045 = vmatmul.mubr.msk.f32.vlgmr.msra.gmra.mrb[0].mxu1 %vm447_vm0, %v550_v24 }
  0x1d   : > { %2145 = vmatpush3.bf16.msra.mxu0 %v2142_v14  ;;  %2033 = vmatprep.mubr.msk.f32.mxu0 %vm447_vm0, %v421_v18  ;;  %v425_v18 = vld [vmem:[%s2574_s5 + $0x10] sm:$0xff] }
  0x1e   : > { %2147 = vmatprep.subr.bf16.mxu0 %v2146_v19  ;;  %2047 = vmatprep.mubr.msk.f32.mxu1 %vm447_vm0, %v551_v25 }
  0x20   : > { %2034 = vmatmul.mubr.msk.f32.gmra.mrb[2].mxu0 %vm447_vm0, %v422_v20  ;;  %2048 = vmatmul.mubr.msk.f32.gmra.mrb[2].mxu1 %vm447_vm0, %v552_v44  ;;  %v2261_v20 = vmov 0.0|0.0  }
  0x21   : > { %2149 = vmatpush3.bf16.msra.mxu0 %v2146_v19  ;;  %2058 = vmatprep.mubr.msk.f32.mxu0 %vm447_vm0, %v678_v21  ;;  %v426_v19 = vld [vmem:[%s2574_s5 + $0x18] sm:$0xff]  ;;  %v2263_v21 = vmov 0.0  }
  0x22   : > { %2150 = vmatprep.subr.bf16.mxu0 %v2261_v20 }
  0x24   : > { %2059 = vmatmul.mubr.msk.f32.vlgmr.msra.gmra.mrb[4].mxu0 %vm447_vm0, %v679_v22 }
  0x25   : > { %2061 = vmatprep.mubr.msk.f32.mxu0 %vm447_vm0, %v680_v45 }
  0x28   : > { %2062 = vmatmul.mubr.msk.f32.gmra.mrb[6].mxu0 %vm447_vm0, %v681_v46 }
  0x29   : > { %2073 = vmatprep.mubr.msk.f32.mxu0 %vm2262_vm3, %v2263_v21 }
  0x87   : > { %v430_v26 = vpop.permute.xlu1 %429 }
  0x88   : > { %v693_v29 = vpop.permute.xlu0 %692 }
  0x8b   : > { %v435_v27 = vpop.permute.xlu1 %434 }
  0x8c   : > { %v698_v35 = vpop.permute.xlu0 %697 }
  0xef   : > { %v2032_v28 = vpop.f32.mrb[0].mxu0  ;;  %v2046_v47 = vpop.f32.mrb[0].mxu1 }
  0xf0   : > { %v532_v30 = vadd.f32 %v2032_v28, %v435_v27  ;;  %v526_v31 = vpop.f32.mrb[1].mxu0  ;;  %v2415_v48 = vpop.f32.mrb[1].mxu1 }
  0xf1   : > { %v527_v32 = vadd.f32 %v526_v31, %v430_v26 }
  0xf2   : > { %546 = vst.msk [vmem:[#allocation3 + $0x8] sm:$0xff] %vm447_vm0, %v532_v30 }
  0xf3   : > { %545 = vst.msk [vmem:[#allocation3] sm:$0xff] %vm447_vm0, %v527_v32  ;;  %v2397_v33 = vpop.f32.mrb[2].mxu0  ;;  %v2421_v53 = vpop.f32.mrb[2].mxu1 }
  0xf4   : > { %v2399_v34 = vpop.f32.mrb[3].mxu0  ;;  %v2423_v54 = vpop.f32.mrb[3].mxu1 }
  0xf7   : > { %v2060_v36 = vpop.f32.mrb[4].mxu0 }
  0xf8   : > { %v795_v37 = vadd.f32 %v2060_v36, %v698_v35  ;;  %v789_v38 = vpop.f32.mrb[5].mxu0 }
  0xf9   : > { %v790_v39 = vadd.f32 %v789_v38, %v693_v29  ;;  %v1033_v41 = vld [vmem:[#allocation3 + $0x8] sm:$0xff] }
  0xfa   : > { %810 = vst.msk [vmem:[#allocation2 + $0x8] sm:$0xff] %vm808_vm1, %v795_v37  ;;  %v814_v40 = vld [vmem:[#allocation3] sm:$0xff] }
  0xfb   : > { %809 = vst.msk [vmem:[#allocation2] sm:$0xff] %vm808_vm1, %v790_v39  ;;  %2064 = vmatprep.subr.mxu1 %v814_v40  ;;  %v2063_v62 = vpop.f32.mrb[6].mxu0 }
  0xfc   : > { %2065 = vmatpush3.msra.mxu1 %v814_v40  ;;  %v799_v0 = vpop.f32.mrb[7].mxu0 }
  0xfd   : > { %2076 = vmatprep.subr.mxu1 %v1033_v41 }
 0x101   : > { %v1032_v42 = vld [vmem:[#allocation2 + $0x8] sm:$0xff] }
 0x102   : > { %1035 = vxpose.xlu1.b32.start.end [1/1] (short) (narrow) %v1032_v42, 16  ;;  %v813_v43 = vld [vmem:[#allocation2] sm:$0xff] }
 0x103   : > { %816 = vxpose.xlu0.b32.start.end [1/1] (short) (narrow) %v813_v43, 16 }
 0x182   : > { %v1051_v50 = vpop.trf.xlu1 }
 0x183   : > { %v832_v49 = vpop.trf.xlu0 }
 0x184   : > { %2066 = vmatprep.mubr.msk.f32.mxu1 %vm848_vm2, %v832_v49 }
 0x186   : > { %v1052_v52 = vpop.trf.xlu1 }
 0x187   : > { %v833_v51 = vpop.trf.xlu0 }
 0x188   : > { %2067 = vmatmul.mubr.msk.f32.vlgmr.msra.gmra.mrb[4].mxu1 %vm848_vm2, %v833_v51 }
 0x189   : > { %2077 = vmatpush3.msra.mxu1 %v1033_v41  ;;  %2078 = vmatprep.mubr.msk.f32.mxu1 %vm848_vm2, %v1051_v50 }
 0x18a   : > { %2154 = vmatprep.subr.bf16.mxu1 %v2261_v20 }
 0x18c   : > { %2079 = vmatmul.mubr.msk.f32.vlgmr.msra.gmra.mrb[6].mxu1 %vm848_vm2, %v1052_v52 }
 0x18d   : > { %2085 = vmatprep.mubr.msk.f32.mxu1 %vm2262_vm3, %v2263_v21 }
 0x25b   : > { %v2425_v55 = vpop.f32.mrb[4].mxu1 }
 0x25c   : > { %v2427_v56 = vpop.f32.mrb[5].mxu1  ;;  %v933_v24 = vsel %vm447_vm0, %v2425_v55, -inf }
 0x25d   : > { %v930_v25 = vsel %vm447_vm0, %v2427_v56, -inf }
 0x25f   : > { %v2080_v57 = vpop.f32.mrb[6].mxu1 }
 0x260   : > { %v1139_v58 = vpop.f32.mrb[7].mxu1  ;;  %v1151_v59 = vsel %vm447_vm0, %v2080_v57, -inf }
 0x261   : > { %1152 = vmax.xlane.f32.xlu1 %v1151_v59  ;;  %v1148_v60 = vsel %vm447_vm0, %v1139_v58, -inf }
 0x262   : > { %1149 = vmax.xlane.f32.xlu0 %v1148_v60 }
 0x272   : > { %707 = vperm.xlu1 %2203, %v689_v61  }
 0x278   : > { %702 = vperm.xlu0 %2202, %v688_v63  }
 0x27c   : > { %564 = vperm.xlu0 %2202, %v554_v1  }
 0x2ee   : > { %v1153_v2 = vpop.xlane.xlu1 %1152 }
 0x2ef   : > { %v1155_v3 = vsub.f32 %v2080_v57, %v1153_v2  ;;  %v1150_v4 = vpop.xlane.xlu0 %1149 }
 0x2f0   : > { %v1154_v5 = vsub.f32 %v1139_v58, %v1150_v4 }
 0x2f1   : > { %v1158_v6 = vmul.f32 1.442695, %v1155_v3 }
 0x2f2   : > { %v1156_v7 = vmul.f32 1.442695, %v1154_v5  ;;  %v708_v8 = vpop.permute.xlu1 %707 }
 0x2f3   : > { %2204 = vpow2.f32 %v1158_v6  ;;  %v805_v9 = vadd.f32 %v2063_v62, %v708_v8 }
 0x2f4   : > { %2206 = vpow2.f32 %v1156_v7 }
 0x2f5   : > { %812 = vst.msk [vmem:[#allocation2 + $0x18] sm:$0xff] %vm808_vm1, %v805_v9 }
 0x2f7   : > { %v703_v10 = vpop.permute.xlu0 %702 }
 0x2f8   : > { %v800_v11 = vadd.f32 %v799_v0, %v703_v10 }
 0x2fa   : > { %811 = vst.msk [vmem:[#allocation2 + $0x10] sm:$0xff] %vm808_vm1, %v800_v11 }
 0x2fb   : > { %v565_v12 = vpop.permute.xlu0 %564 }
 0x2fc   : > { %v661_v13 = vadd.f32 %v2046_v47, %v565_v12  ;;  %v1468_v22 = vld [vmem:[#allocation2 + $0x18] sm:$0xff] }
 0x2fd   : > { %v2205_v14 = vpop.eup %2204 }
 0x2fe   : > { %v2207_v15 = vpop.eup %2206  ;;  %675 = vst.msk [vmem:[#allocation4 + $0x8] sm:$0xff] %vm447_vm0, %v661_v13  ;;  %v1163_v16 = vsel %vm447_vm0, %v2205_v14, 0.0 }
 0x2ff   : > { %1164 = vadd.xlane.f32.xlu1 %v1163_v16  ;;  %v1160_v17 = vsel %vm447_vm0, %v2207_v15, 0.0 }
 0x300   : > { %1161 = vadd.xlane.f32.xlu0 %v1160_v17 }
 0x301   : > { %v1250_v23 = vld [vmem:[#allocation2 + $0x10] sm:$0xff] }
 0x305   : > { %v1034_v40 = vld [vmem:[#allocation4 + $0x8] sm:$0xff] }
 0x310   : > { %439 = vperm.xlu1 %2203, %v425_v18  }
 0x316   : > { %444 = vperm.xlu0 %2202, %v426_v19  }
 0x334   : > { %1471 = vxpose.xlu0.b32.start.end [1/1] (short) (narrow) %v1468_v22, 16 }
 0x339   : > { %1253 = vxpose.xlu1.b32.start.end [1/1] (short) (narrow) %v1250_v23, 16 }
 0x364   : > { %934 = vmax.xlane.f32.xlu1 %v933_v24 }
 0x365   : > { %931 = vmax.xlane.f32.xlu0 %v930_v25 }
 0x38c   : > { %v1165_v26 = vpop.xlane.xlu1 %1164 }
 0x38d   : > { %2208 = vrcp.f32 %v1165_v26  ;;  %v1162_v27 = vpop.xlane.xlu0 %1161 }
 0x38e   : > { %2210 = vrcp.f32 %v1162_v27 }
 0x390   : > { %v440_v28 = vpop.permute.xlu1 %439 }
 0x391   : > { %v537_v29 = vadd.f32 %v2399_v34, %v440_v28 }
 0x393   : > { %547 = vst.msk [vmem:[#allocation3 + $0x10] sm:$0xff] %vm447_vm0, %v537_v29 }
 0x395   : > { %v445_v30 = vpop.permute.xlu0 %444 }
 0x396   : > { %v542_v31 = vadd.f32 %v2397_v33, %v445_v30 }
 0x397   : > { %v2209_v32 = vpop.eup %2208 }
 0x398   : > { %v2211_v35 = vpop.eup %2210  ;;  %v1169_v36 = vmul.f32 %v2209_v32, %v2205_v14  ;;  %548 = vst.msk [vmem:[#allocation3 + $0x18] sm:$0xff] %vm447_vm0, %v542_v31 }
 0x399   : > { %v1167_v37 = vmul.f32 %v2211_v35, %v2207_v15  ;;  %v555_v35 = vld [vmem:[%s2576_s7 + $0x10] sm:$0xff] }
 0x39a   : > { %v1251_v34 = vld [vmem:[#allocation3 + $0x10] sm:$0xff] }
 0x39b   : > { %v2155_v39 = vpack.c.bf16 %v1169_v36, %v1167_v37  ;;  %v556_v36 = vld [vmem:[%s2576_s7 + $0x18] sm:$0xff]  ;;  %v553_v37 = vld [vmem:[%s2576_s7] sm:$0xff] }
 0x39d   : > { %2157 = vmatpush3.bf16.xpose.msk.msra.mxu1 %vm2467_vm4, %v2155_v39  ;;  %v1695_v39 = vld [vmem:[%s2578_s9 + $0x8] sm:$0xff] }
 0x39e   : > { %2088 = vmatprep.subr.mxu1 %v1251_v34 }
 0x39f   : > { %v1469_v33 = vld [vmem:[#allocation3 + $0x18] sm:$0xff] }
 0x3a4   : > { %2086 = vmatmul.mubr.msk.f32.vlgmr.msra.gmra.mrb[8].mxu1 %vm447_vm0, %v1034_v40  ;;  %v1696_v40 = vld [vmem:[%s2578_s9 + $0x10] sm:$0xff] }
 0x3a5   : > { %2089 = vmatpush3.msra.mxu1 %v1251_v34  ;;  %v1697_v34 = vld [vmem:[%s2578_s9 + $0x18] sm:$0xff] }
 0x3a6   : > { %2100 = vmatprep.subr.mxu1 %v1469_v33 }
 0x3b4   : > { %v1487_v42 = vpop.trf.xlu0 }
 0x3b8   : > { %v1488_v44 = vpop.trf.xlu0 }
 0x3b9   : > { %v1269_v41 = vpop.trf.xlu1 }
 0x3ba   : > { %2090 = vmatprep.mubr.msk.f32.mxu1 %vm848_vm2, %v1269_v41 }
 0x3bd   : > { %v1270_v43 = vpop.trf.xlu1 }
 0x3be   : > { %2091 = vmatmul.mubr.msk.f32.vlgmr.msra.gmra.mrb[10].mxu1 %vm848_vm2, %v1270_v43 }
 0x3bf   : > { %2101 = vmatpush3.msra.mxu1 %v1469_v33  ;;  %2102 = vmatprep.mubr.msk.f32.mxu1 %vm848_vm2, %v1487_v42 }
 0x3c0   : > { %2162 = vmatprep.subr.bf16.mxu1 %v2261_v20 }
 0x3c2   : > { %2103 = vmatmul.mubr.msk.f32.vlgmr.msra.gmra.mrb[12].mxu1 %vm848_vm2, %v1488_v44 }
 0x3c3   : > { %2109 = vmatprep.mubr.msk.f32.mxu1 %vm2262_vm3, %v2263_v21 }
 0x3f1   : > { %v935_v47 = vpop.xlane.xlu1 %934 }
 0x3f2   : > { %v932_v49 = vpop.xlane.xlu0 %931  ;;  %v937_v50 = vsub.f32 %v2425_v55, %v935_v47 }
 0x3f3   : > { %v936_v51 = vsub.f32 %v2427_v56, %v932_v49 }
 0x3f4   : > { %v940_v52 = vmul.f32 1.442695, %v937_v50 }
 0x3f5   : > { %v938_v57 = vmul.f32 1.442695, %v936_v51 }
 0x3f6   : > { %2212 = vpow2.f32 %v940_v52 }
 0x3f7   : > { %2214 = vpow2.f32 %v938_v57 }
 0x400   : > { %v2213_v1 = vpop.eup %2212 }
 0x401   : > { %v2215_v56 = vpop.eup %2214  ;;  %v945_v2 = vsel %vm447_vm0, %v2213_v1, 0.0 }
 0x402   : > { %v942_v3 = vsel %vm447_vm0, %v2215_v56, 0.0 }
 0x477   : > { %v1245_v45 = vpop.f32.mrb[8].mxu1 }
 0x478   : > { %1249 = vst.msk [vmem:[#allocation5 + $0x8] sm:$0xff] %vm808_vm1, %v1245_v45  ;;  %v2087_v46 = vpop.f32.mrb[9].mxu1 }
 0x491   : > { %v2092_v58 = vpop.f32.mrb[10].mxu1 }
 0x492   : > { %v1357_v59 = vpop.f32.mrb[11].mxu1  ;;  %v1369_v60 = vsel %vm447_vm0, %v2092_v58, -inf }
 0x493   : > { %1370 = vmax.xlane.f32.xlu1 %v1369_v60  ;;  %v1366_v61 = vsel %vm447_vm0, %v1357_v59, -inf }
 0x494   : > { %1367 = vmax.xlane.f32.xlu0 %v1366_v61 }
 0x495   : > { %v2104_v62 = vpop.f32.mrb[12].mxu1 }
 0x496   : > { %v1575_v63 = vpop.f32.mrb[13].mxu1  ;;  %v1587_v0 = vsel %vm447_vm0, %v2104_v62, -inf }
 0x497   : > { %1588 = vmax.xlane.f32.xlu1 %v1587_v0  ;;  %v1584_v55 = vsel %vm447_vm0, %v1575_v63, -inf }
 0x498   : > { %1585 = vmax.xlane.f32.xlu0 %v1584_v55 }
 0x49b   : > { %946 = vadd.xlane.f32.xlu1 %v945_v2 }
 0x49c   : > { %943 = vadd.xlane.f32.xlu0 %v942_v3 }
 0x520   : > { %v1371_v4 = vpop.xlane.xlu1 %1370 }
 0x521   : > { %v1373_v5 = vsub.f32 %v2092_v58, %v1371_v4  ;;  %v1368_v6 = vpop.xlane.xlu0 %1367  ;;  %v1691_v4 = vld [vmem:[#allocation5 + $0x8] sm:$0xff] }
 0x522   : > { %v1372_v7 = vsub.f32 %v1357_v59, %v1368_v6 }
 0x523   : > { %v1376_v8 = vmul.f32 1.442695, %v1373_v5 }
 0x524   : > { %v1374_v9 = vmul.f32 1.442695, %v1372_v7  ;;  %v1589_v10 = vpop.xlane.xlu1 %1588 }
 0x525   : > { %2216 = vpow2.f32 %v1376_v8  ;;  %v1591_v11 = vsub.f32 %v2104_v62, %v1589_v10  ;;  %v1586_v12 = vpop.xlane.xlu0 %1585  ;;  %v1687_v10 = vld [vmem:[%s2577_s8 + $0x8] sm:$0xff] }
 0x526   : > { %2218 = vpow2.f32 %v1374_v9  ;;  %v1590_v13 = vsub.f32 %v1575_v63, %v1586_v12  ;;  %v1689_v12 = vld [vmem:[%s2577_s8 + $0x18] sm:$0xff] }
 0x527   : > { %v1594_v14 = vmul.f32 1.442695, %v1591_v11  ;;  %v1688_v11 = vld [vmem:[%s2577_s8 + $0x10] sm:$0xff] }
 0x528   : > { %v1592_v15 = vmul.f32 1.442695, %v1590_v13  ;;  %v947_v16 = vpop.xlane.xlu1 %946 }
 0x529   : > { %2220 = vpow2.f32 %v1594_v14  ;;  %v944_v17 = vpop.xlane.xlu0 %943 }
 0x52a   : > { %2222 = vpow2.f32 %v1592_v15 }
 0x52b   : > { %2224 = vrcp.f32 %v947_v16 }
 0x52c   : > { %2226 = vrcp.f32 %v944_v17 }
 0x52f   : > { %v2217_v18 = vpop.eup %2216 }
 0x530   : > { %v2219_v19 = vpop.eup %2218  ;;  %v1381_v22 = vsel %vm447_vm0, %v2217_v18, 0.0 }
 0x531   : > { %1382 = vadd.xlane.f32.xlu1 %v1381_v22  ;;  %v1378_v23 = vsel %vm447_vm0, %v2219_v19, 0.0 }
 0x532   : > { %1379 = vadd.xlane.f32.xlu0 %v1378_v23 }
 0x533   : > { %v2221_v24 = vpop.eup %2220 }
 0x534   : > { %v2223_v25 = vpop.eup %2222  ;;  %v1599_v26 = vsel %vm447_vm0, %v2221_v24, 0.0 }
 0x535   : > { %v2225_v27 = vpop.eup %2224  ;;  %1600 = vadd.xlane.f32.xlu1 %v1599_v26  ;;  %v1596_v28 = vsel %vm447_vm0, %v2223_v25, 0.0 }
 0x536   : > { %v2227_v29 = vpop.eup %2226  ;;  %v951_v30 = vmul.f32 %v2225_v27, %v2213_v1  ;;  %1597 = vadd.xlane.f32.xlu0 %v1596_v28  ;;  %v1686_v1 = vld [vmem:[%s2577_s8] sm:$0xff] }
 0x537   : > { %v949_v31 = vmul.f32 %v2227_v29, %v2215_v56 }
 0x539   : > { %v2151_v32 = vpack.c.bf16 %v951_v30, %v949_v31 }
 0x53b   : > { %2153 = vmatpush3.bf16.xpose.msk.msra.mxu0 %vm2467_vm4, %v2151_v32 }
 0x53c   : > { %2158 = vmatprep.subr.bf16.mxu0 %v2261_v20  ;;  %v1694_v20 = vld [vmem:[%s2578_s9] sm:$0xff] }
 0x546   : > { %569 = vperm.xlu1 %2203, %v555_v35  }
 0x54a   : > { %574 = vperm.xlu1 %2203, %v556_v36  }
 0x54c   : > { %559 = vperm.xlu0 %2202, %v553_v37  }
 0x54e   : > { %1705 = vperm.xlu1 %2203, %v1695_v39  }
 0x550   : > { %1700 = vperm.xlu0 %2202, %v1694_v20  }
 0x552   : > { %1715 = vperm.xlu1 %2203, %v1697_v34  }
 0x554   : > { %1710 = vperm.xlu0 %2202, %v1696_v40  }
 0x5be   : > { %v1383_v33 = vpop.xlane.xlu1 %1382 }
 0x5bf   : > { %v1380_v41 = vpop.xlane.xlu0 %1379  ;;  %2228 = vrcp.f32 %v1383_v33 }
 0x5c0   : > { %2230 = vrcp.f32 %v1380_v41 }
 0x5c2   : > { %v1601_v42 = vpop.xlane.xlu1 %1600 }
 0x5c3   : > { %2232 = vrcp.f32 %v1601_v42  ;;  %v1598_v43 = vpop.xlane.xlu0 %1597 }
 0x5c4   : > { %2234 = vrcp.f32 %v1598_v43 }
 0x5c6   : > { %v570_v44 = vpop.permute.xlu1 %569 }
 0x5c7   : > { %v666_v45 = vadd.f32 %v2423_v54, %v570_v44 }
 0x5c9   : > { %676 = vst.msk [vmem:[#allocation4 + $0x10] sm:$0xff] %vm447_vm0, %v666_v45  ;;  %v2229_v47 = vpop.eup %2228 }
 0x5ca   : > { %v575_v46 = vpop.permute.xlu1 %574  ;;  %v2231_v51 = vpop.eup %2230  ;;  %v1387_v61 = vmul.f32 %v2229_v47, %v2217_v18 }
 0x5cb   : > { %v671_v49 = vadd.f32 %v2421_v53, %v575_v46  ;;  %v560_v50 = vpop.permute.xlu0 %559  ;;  %v1385_v54 = vmul.f32 %v2231_v51, %v2219_v19 }
 0x5cc   : > { %v656_v52 = vadd.f32 %v2415_v48, %v560_v50 }
 0x5cd   : > { %v2233_v57 = vpop.eup %2232  ;;  %677 = vst.msk [vmem:[#allocation4 + $0x18] sm:$0xff] %vm447_vm0, %v671_v49  ;;  %v2159_v53 = vpack.c.bf16 %v1387_v61, %v1385_v54 }
 0x5ce   : > { %v2235_v58 = vpop.eup %2234  ;;  %v1605_v59 = vmul.f32 %v2233_v57, %v2221_v24  ;;  %674 = vst.msk [vmem:[#allocation4] sm:$0xff] %vm447_vm0, %v656_v52  ;;  %v1706_v13 = vpop.permute.xlu1 %1705 }
 0x5cf   : > { %v1603_v60 = vmul.f32 %v2235_v58, %v2223_v25  ;;  %v1701_v14 = vpop.permute.xlu0 %1700 }
 0x5d0   : > { %v1252_v0 = vld [vmem:[#allocation4 + $0x10] sm:$0xff] }
 0x5d1   : > { %v2163_v62 = vpack.c.bf16 %v1605_v59, %v1603_v60 }
 0x5d2   : > { %v1716_v19 = vpop.permute.xlu1 %1715 }
 0x5d3   : > { %2165 = vmatpush3.bf16.xpose.msk.msra.mxu1 %vm2467_vm4, %v2163_v62  ;;  %v1711_v23 = vpop.permute.xlu0 %1710 }
 0x5d4   : > { %v1470_v48 = vld [vmem:[#allocation4 + $0x18] sm:$0xff] }
 0x5d5   : > { %v815_v63 = vld [vmem:[#allocation4] sm:$0xff] }
 0x5d6   : > { %2074 = vmatmul.mubr.msk.f32.vlgmr.msra.gmra.mrb[8].mxu0 %vm447_vm0, %v815_v63 }
 0x5d7   : > { %2161 = vmatpush3.bf16.xpose.msk.msra.mxu0 %vm2467_vm4, %v2159_v53  ;;  %2097 = vmatprep.mubr.msk.f32.mxu0 %vm2262_vm3, %v2263_v21 }
 0x5da   : > { %2110 = vmatmul.mubr.msk.f32.vlgmr.msra.gmra.mrb[14].mxu1 %vm447_vm0, %v1470_v48 }
 0x5de   : > { %2098 = vmatmul.mubr.msk.f32.vlgmr.msra.gmra.mrb[10].mxu0 %vm447_vm0, %v1252_v0 }
 0x5df   : > { %2120 = vmatprep.mubr.msk.f32.mxu0 %vm447_vm0, %v1686_v1 }
 0x6a9   : > { %v1027_v55 = vpop.f32.mrb[8].mxu0 }
 0x6aa   : > { %1031 = vst.msk [vmem:[#allocation5] sm:$0xff] %vm808_vm1, %v1027_v55  ;;  %v2075_v38 = vpop.f32.mrb[9].mxu0 }
 0x6ad   : > { %v1681_v56 = vpop.f32.mrb[14].mxu1 }
 0x6ae   : > { %1685 = vst.msk [vmem:[#allocation5 + $0x18] sm:$0xff] %vm808_vm1, %v1681_v56  ;;  %v2111_v21 = vpop.f32.mrb[15].mxu1 }
 0x6b1   : > { %v1463_v2 = vpop.f32.mrb[10].mxu0  ;;  %v1690_v3 = vld [vmem:[#allocation5] sm:$0xff] }
 0x6b2   : > { %1467 = vst.msk [vmem:[#allocation5 + $0x10] sm:$0xff] %vm808_vm1, %v1463_v2  ;;  %v2099_v5 = vpop.f32.mrb[11].mxu0  ;;  %v2166_v6 = vpack.c.bf16 %v1691_v4, %v1690_v3 }
 0x6b4   : > { %2167 = vmatprep.subr.bf16.mxu0 %v2166_v6 }
 0x6b5   : > { %2169 = vmatpush3.bf16.msra.mxu0 %v2166_v6  ;;  %v1693_v8 = vld [vmem:[#allocation5 + $0x18] sm:$0xff] }
 0x6b9   : > { %v1692_v7 = vld [vmem:[#allocation5 + $0x10] sm:$0xff] }
 0x6ba   : > { %v2170_v9 = vpack.c.bf16 %v1693_v8, %v1692_v7 }
 0x6bc   : > { %2171 = vmatprep.subr.bf16.mxu0 %v2170_v9 }
 0x6bd   : > { %2173 = vmatpush3.bf16.msra.mxu0 %v2170_v9 }
 0x6c0   : > { %2121 = vmatmul.mubr.msk.f32.vlgmr.msra.gmra.mrb[12].mxu0 %vm447_vm0, %v1687_v10 }
 0x6c1   : > { %2123 = vmatprep.mubr.msk.f32.mxu0 %vm447_vm0, %v1688_v11 }
 0x6c4   : > { %2124 = vmatmul.mubr.msk.f32.gmra.mrb[14].mxu0 %vm447_vm0, %v1689_v12 }
 0x793   : > { %v2122_v15 = vpop.f32.mrb[12].mxu0 }
 0x794   : > { %v1802_v16 = vadd.f32 %v2122_v15, %v1706_v13  ;;  %v1796_v17 = vpop.f32.mrb[13].mxu0 }
 0x795   : > { %v1797_v18 = vadd.f32 %v1796_v17, %v1701_v14 }
 0x796   : > { %1816 = vst.msk [vmem:[%s410_s26 + $0x8] sm:$0xff] %vm808_vm1, %v1802_v16 }
 0x797   : > { %1815 = vst.msk [vmem:[%s410_s26] sm:$0xff] %vm808_vm1, %v1797_v18  ;;  %v2125_v22 = vpop.f32.mrb[14].mxu0 }
 0x798   : > { %v1812_v24 = vadd.f32 %v2125_v22, %v1716_v19  ;;  %v1806_v25 = vpop.f32.mrb[15].mxu0 }
 0x799   : > { %v1807_v26 = vadd.f32 %v1806_v25, %v1711_v23 }
 0x79a   : > { %1818 = vst.msk [vmem:[%s410_s26 + $0x18] sm:$0xff] %vm808_vm1, %v1812_v24 }
 0x79b   : > { %1817 = vst.msk [vmem:[%s410_s26 + $0x10] sm:$0xff] %vm808_vm1, %v1807_v26 }
 0x79c PF: > { %s20_s15 = sadd.s32 1, %s2258_s15   ;;  %s2582_s13 = smov %s2254_s14 }
 0x79d   : > { %p17_p5 = scmp.ge.s32.totalorder %s20_s15, 4   ;;  %s2583_s14 = smov %s2585_s16 }
 0x79f   :  { %19 = sbr.rel (!%p17_p5) target bundleno = 2 (0x2), region = 97 }

</bundles_post_ra>
